<compile_context>
chip_gen: v7x
topology: tpu7x:2x2x1
jax: 0.10.0
libtpu: 0.0.40
codegen_flags: <defaults>
</compile_context>

<pallas_src>
import functools

import jax
import jax.numpy as jnp
from jax import lax
from jax.experimental import pallas as pl
from jax.experimental.pallas import tpu as pltpu


def _fmix32(x):
    """Murmur3 finalizer on int32 (wrapping mults; logical shifts via mask)."""
    x = x ^ ((x >> 16) & jnp.int32(0x0000FFFF))
    x = x * jnp.int32(-2048144789)          # 0x85ebca6b
    x = x ^ ((x >> 13) & jnp.int32(0x0007FFFF))
    x = x * jnp.int32(-1028477387)          # 0xc2b2ae35
    x = x ^ ((x >> 16) & jnp.int32(0x0000FFFF))
    return x


def _prenet_kernel(seed_ref, x_ref, w1_ref, b1_ref, w2_ref, b2_ref, o_ref,
                   *, dropout_rate: float, train: bool, tile_m: int):
    apply_dropout = train and dropout_rate > 0.0
    keep_prob = 1.0 - float(dropout_rate)

    if apply_dropout:
        # signed threshold so the compare stays in int32
        thresh = min(int(round(keep_prob * 4294967296.0)), 4294967295) - 2147483648
        inv_keep = 1.0 / keep_prob
        pid = pl.program_id(0)
        salt = seed_ref[0] * jnp.int32(-1640531527)   # 0x9e3779b9

    def dropout(h, layer_salt):
        if not apply_dropout:
            return h
        shape = h.shape
        r = lax.broadcasted_iota(jnp.int32, shape, 0)
        c = lax.broadcasted_iota(jnp.int32, shape, 1)
        # globally unique counter per element of this layer (per-tile seeding
        # comes from the pid term), mixed with the user seed and a layer salt.
        idx = (pid * jnp.int32(tile_m) + r) * jnp.int32(shape[1]) + c
        bits = _fmix32(idx ^ salt ^ jnp.int32(layer_salt))
        keep = bits < jnp.int32(thresh)
        return jnp.where(keep, h * jnp.float32(inv_keep), jnp.float32(0.0))

    # layer 1: bf16 x bf16 -> f32 on the MXU, then bias + ReLU + dropout in f32
    h = jnp.dot(x_ref[...], w1_ref[...], preferred_element_type=jnp.float32)
    h = jnp.maximum(h + b1_ref[...], 0.0)
    h = dropout(h, 0x13579B)

    # layer 2
    h = jnp.dot(h.astype(w2_ref.dtype), w2_ref[...],
                preferred_element_type=jnp.float32)
    h = jnp.maximum(h + b2_ref[...], 0.0)
    h = dropout(h, 0x2468AC)

    o_ref[...] = h.astype(o_ref.dtype)


def prenet_forward(x, params, *, dropout_rate=0.5, train=False, seed=0,
                   tile_m=256):
    """x: (..., in_dim). params: w1 (in, h1), b1 (1, h1), w2 (h1, h2), b2 (1, h2)."""
    w1, b1, w2, b2 = params["w1"], params["b1"], params["w2"], params["b2"]
    in_dim, h1 = w1.shape
    h2 = w2.shape[1]

    lead_shape = x.shape[:-1]
    n_rows = 1
    for d in lead_shape:
        n_rows *= d
    x2d = x.reshape(n_rows, in_dim)

    # pad rows up to a multiple of the tile (MXU-friendly, multiple of 16 for bf16)
    n_pad = ((n_rows + tile_m - 1) // tile_m) * tile_m
    if n_pad != n_rows:
        x2d = jnp.pad(x2d, ((0, n_pad - n_rows), (0, 0)))

    # bf16 MXU inputs, f32 accumulation; biases stay f32
    x_bf = x2d.astype(jnp.bfloat16)
    w1_bf = w1.astype(jnp.bfloat16)
    w2_bf = w2.astype(jnp.bfloat16)
    b1_f = b1.astype(jnp.float32)
    b2_f = b2.astype(jnp.float32)
    seed_arr = jnp.asarray([seed], dtype=jnp.int32)

    grid = (n_pad // tile_m,)
    kernel = functools.partial(_prenet_kernel,
                               dropout_rate=float(dropout_rate),
                               train=bool(train),
                               tile_m=int(tile_m))

    flops = 2 * n_pad * (in_dim * h1 + h1 * h2)
    bytes_accessed = (x_bf.size * 2 + w1_bf.size * 2 + w2_bf.size * 2
                      + b1_f.size * 4 + b2_f.size * 4 + n_pad * h2 * 4)

    out2d = pl.pallas_call(
        kernel,
        out_shape=jax.ShapeDtypeStruct((n_pad, h2), jnp.float32),
        grid_spec=pltpu.PrefetchScalarGridSpec(
            num_scalar_prefetch=1,            # seed lands in SMEM
            grid=grid,
            in_specs=[
                pl.BlockSpec((tile_m, in_dim), lambda i, seed: (i, 0)),
                pl.BlockSpec((in_dim, h1),     lambda i, seed: (0, 0)),  # resident
                pl.BlockSpec((1, h1),          lambda i, seed: (0, 0)),  # resident
                pl.BlockSpec((h1, h2),         lambda i, seed: (0, 0)),  # resident
                pl.BlockSpec((1, h2),          lambda i, seed: (0, 0)),  # resident
            ],
            out_specs=pl.BlockSpec((tile_m, h2), lambda i, seed: (i, 0)),
        ),
        compiler_params=pltpu.CompilerParams(
            dimension_semantics=("parallel",)),
        cost_estimate=pl.CostEstimate(flops=flops, transcendentals=0,
                                      bytes_accessed=bytes_accessed),
    )(seed_arr, x_bf, w1_bf, b1_f, w2_bf, b2_f)

    return out2d[:n_rows].reshape(*lead_shape, h2)


def init_prenet_params(key, in_dim, sizes=(256, 128)):
    """Deterministic synthetic init; weights stored (in, out) = PyTorch W.T."""
    in_sizes = [in_dim] + list(sizes[:-1])
    params = {}
    ks = jax.random.split(key, 2 * len(sizes))
    for i, (n_in, n_out) in enumerate(zip(in_sizes, sizes)):
        bound = 1.0 / jnp.sqrt(jnp.float32(n_in))
        w = jax.random.uniform(ks[2 * i], (n_in, n_out), jnp.float32,
                               minval=-bound, maxval=bound)
        b = jax.random.uniform(ks[2 * i + 1], (1, n_out), jnp.float32,
                               minval=-bound, maxval=bound)
        params[f"w{i + 1}"] = w
        params[f"b{i + 1}"] = b
    return params


def prenet_reference(x, params):
    """Pure-JAX eval-mode reference with the same bf16-input / f32-accum numerics."""
    rnd = lambda a: a.astype(jnp.bfloat16).astype(jnp.float32)
    h = jnp.maximum(rnd(x) @ rnd(params["w1"]) + params["b1"][0], 0.0)
    h = jnp.maximum(rnd(h) @ rnd(params["w2"]) + params["b2"][0], 0.0)
    return h


if __name__ == "__main__":
    key = jax.random.PRNGKey(0)
    k_param, k_x = jax.random.split(key)

    B, T, in_dim = 2, 8, 32
    sizes = (256, 128)

    params = init_prenet_params(k_param, in_dim, sizes)
    x = jax.random.normal(k_x, (B, T, in_dim), jnp.float32)

    # Eval mode (dropout = identity): must match the pure-JAX reference.
    # TODO(synk): classic Tacotron Prenet keeps dropout active at eval; this
    # follows the given nn.Module (nn.Dropout => identity in eval mode).
    out_eval = prenet_forward(x, params, dropout_rate=0.5, train=False)
    out_eval = jax.block_until_ready(out_eval)
    ref = prenet_reference(x.reshape(-1, in_dim), params).reshape(B, T, sizes[-1])
    assert out_eval.shape == (B, T, sizes[-1])
    assert jnp.allclose(out_eval, ref, atol=5e-3, rtol=5e-3), "eval-mode mismatch"

    # Training mode: exercises the in-kernel hashed-dropout path.
    out_train = prenet_forward(x, params, dropout_rate=0.5, train=True, seed=1234)
    out_train = jax.block_until_ready(out_train)
    assert out_train.shape == (B, T, sizes[-1])
    assert bool(jnp.all(jnp.isfinite(out_train)))
    assert not bool(jnp.allclose(out_train, out_eval)), "dropout had no effect"

    print("KERNEL_OK")
</pallas_src>

<mosaic_0001>
module attributes {stable_mosaic.version = 11 : i64} {
  func.func @_prenet_kernel(%arg0: i32, %arg1: memref<1xi32, #tpu.memory_space<smem>>, %arg2: memref<256x32xbf16, #tpu.memory_space<vmem>>, %arg3: memref<32x256xbf16, #tpu.memory_space<vmem>>, %arg4: memref<1x256xf32, #tpu.memory_space<vmem>>, %arg5: memref<256x128xbf16, #tpu.memory_space<vmem>>, %arg6: memref<1x128xf32, #tpu.memory_space<vmem>>, %arg7: memref<256x128xf32, #tpu.memory_space<vmem>>) attributes {dimension_semantics = [#tpu.dimension_semantics<parallel>], iteration_bounds = array<i64: 1>, scalar_prefetch = 1 : i64, scratch_operands = 0 : i64, tpu.core_type = #tpu.core_type<tc>, window_params = [{transform_indices = @transform_0, window_bounds = array<i64: 256, 32>}, {pipeline_mode = #tpu.pipeline_mode<synchronous>, transform_indices = @transform_1, window_bounds = array<i64: 32, 256>}, {pipeline_mode = #tpu.pipeline_mode<synchronous>, transform_indices = @transform_2, window_bounds = array<i64: 1, 256>}, {pipeline_mode = #tpu.pipeline_mode<synchronous>, transform_indices = @transform_3, window_bounds = array<i64: 256, 128>}, {pipeline_mode = #tpu.pipeline_mode<synchronous>, transform_indices = @transform_4, window_bounds = array<i64: 1, 128>}, {transform_indices = @transform_5, window_bounds = array<i64: 256, 128>}]} {
    %c0 = arith.constant 0 : index
    %c0_0 = arith.constant 0 : index
    %0 = vector.load %arg2[%c0, %c0_0] : memref<256x32xbf16, #tpu.memory_space<vmem>>, vector<256x32xbf16>
    %c0_1 = arith.constant 0 : index
    %c0_2 = arith.constant 0 : index
    %1 = vector.load %arg3[%c0_1, %c0_2] : memref<32x256xbf16, #tpu.memory_space<vmem>>, vector<32x256xbf16>
    %cst = arith.constant dense<0.000000e+00> : vector<256x256xf32>
    %2 = tpu.matmul %0, %1, %cst {dimension_numbers = #tpu.dot_dimension_numbers<[1], [0], [0], [1], [0, 0, 1, 1], [], []>} : vector<256x32xbf16>, vector<32x256xbf16>, vector<256x256xf32> -> vector<256x256xf32>
    %c0_3 = arith.constant 0 : index
    %c0_4 = arith.constant 0 : index
    %3 = vector.load %arg4[%c0_3, %c0_4] : memref<1x256xf32, #tpu.memory_space<vmem>>, vector<1x256xf32>
    %4 = vector.broadcast %3 : vector<1x256xf32> to vector<256x256xf32>
    %5 = arith.addf %2, %4 : vector<256x256xf32>
    %cst_5 = arith.constant 0.000000e+00 : f32
    %6 = vector.broadcast %cst_5 : f32 to vector<256x256xf32>
    %7 = arith.maximumf %5, %6 : vector<256x256xf32>
    %8 = arith.truncf %7 : vector<256x256xf32> to vector<256x256xbf16>
    %c0_6 = arith.constant 0 : index
    %c0_7 = arith.constant 0 : index
    %9 = vector.load %arg5[%c0_6, %c0_7] : memref<256x128xbf16, #tpu.memory_space<vmem>>, vector<256x128xbf16>
    %cst_8 = arith.constant dense<0.000000e+00> : vector<256x128xf32>
    %10 = tpu.matmul %8, %9, %cst_8 {dimension_numbers = #tpu.dot_dimension_numbers<[1], [0], [0], [1], [0, 0, 1, 1], [], []>} : vector<256x256xbf16>, vector<256x128xbf16>, vector<256x128xf32> -> vector<256x128xf32>
    %c0_9 = arith.constant 0 : index
    %c0_10 = arith.constant 0 : index
    %11 = vector.load %arg6[%c0_9, %c0_10] : memref<1x128xf32, #tpu.memory_space<vmem>>, vector<1x128xf32>
    %12 = vector.broadcast %11 : vector<1x128xf32> to vector<256x128xf32>
    %13 = arith.addf %10, %12 : vector<256x128xf32>
    %cst_11 = arith.constant 0.000000e+00 : f32
    %14 = vector.broadcast %cst_11 : f32 to vector<256x128xf32>
    %15 = arith.maximumf %13, %14 : vector<256x128xf32>
    %c0_12 = arith.constant 0 : index
    %c0_13 = arith.constant 0 : index
    %16 = vector.load %arg7[%c0_12, %c0_13] : memref<256x128xf32, #tpu.memory_space<vmem>>, vector<256x128xf32>
    tpu.vector_store %arg7[%c0_12, %c0_13], %15 {strides = array<i32>} : memref<256x128xf32, #tpu.memory_space<vmem>>, vector<256x128xf32>,
    return
  }
  func.func @transform_0(%arg0: i32, %arg1: memref<1xi32, #tpu.memory_space<smem>>) -> (i32, i32) {
    %c0_i32 = arith.constant 0 : i32
    %c0_i32_0 = arith.constant 0 : i32
    return %arg0, %c0_i32 : i32, i32
  }
  func.func @transform_1(%arg0: i32, %arg1: memref<1xi32, #tpu.memory_space<smem>>) -> (i32, i32) {
    %c0_i32 = arith.constant 0 : i32
    %c0_i32_0 = arith.constant 0 : i32
    %c0_i32_1 = arith.constant 0 : i32
    return %c0_i32, %c0_i32_0 : i32, i32
  }
  func.func @transform_2(%arg0: i32, %arg1: memref<1xi32, #tpu.memory_space<smem>>) -> (i32, i32) {
    %c0_i32 = arith.constant 0 : i32
    %c0_i32_0 = arith.constant 0 : i32
    %c0_i32_1 = arith.constant 0 : i32
    return %c0_i32, %c0_i32_0 : i32, i32
  }
  func.func @transform_3(%arg0: i32, %arg1: memref<1xi32, #tpu.memory_space<smem>>) -> (i32, i32) {
    %c0_i32 = arith.constant 0 : i32
    %c0_i32_0 = arith.constant 0 : i32
    %c0_i32_1 = arith.constant 0 : i32
    return %c0_i32, %c0_i32_0 : i32, i32
  }
  func.func @transform_4(%arg0: i32, %arg1: memref<1xi32, #tpu.memory_space<smem>>) -> (i32, i32) {
    %c0_i32 = arith.constant 0 : i32
    %c0_i32_0 = arith.constant 0 : i32
    %c0_i32_1 = arith.constant 0 : i32
    return %c0_i32, %c0_i32_0 : i32, i32
  }
  func.func @transform_5(%arg0: i32, %arg1: memref<1xi32, #tpu.memory_space<smem>>) -> (i32, i32) {
    %c0_i32 = arith.constant 0 : i32
    %c0_i32_0 = arith.constant 0 : i32
    return %arg0, %c0_i32 : i32, i32
  }
}

</mosaic_0001>

<bundles_post_ra>
// kernel: tpu_custom_call.1
= control target key start
LH: loop header
LB: loop body
LE: loop exit
PB: predicated region body
PF: predicated region fallthrough
CT: control target
= control target key end

     0   :  { %v1133_v2 = vmov 0   ;;  %vm172_vm0 = vcmask 261120   ;;  %s1432_s0 = inlined_call_operand.<no memory space> [shape: s32[1], index: 0, kind: input, shape index: {}]   ;;  %s1433_s1 = inlined_call_operand.vmem [shape: bf16[256,32], index: 1, kind: input, shape index: {}]   ;;  %s1434_s2 = inlined_call_operand.vmem [shape: bf16[32,256], index: 2, kind: input, shape index: {}]   ;;  %s1435_s3 = inlined_call_operand.vmem [shape: f32[1,256], index: 3, kind: input, shape index: {}]   ;;  %s1436_s4 = inlined_call_operand.vmem [shape: bf16[256,128], index: 4, kind: input, shape index: {}]   ;;  %s1437_s5 = inlined_call_operand.vmem [shape: f32[1,128], index: 5, kind: input, shape index: {}]   ;;  %s1438_s6 = inlined_call_operand.hbm [shape: f32[256,128], index: 6, kind: output, shape index: {}]  }
   0x1   :  { %v1071_v0 = vld [vmem:[%s1434_s2 + $0x4] ss:$8 sps:$4 sm:$0xff]   ;;  %v1073_v1 = vld [vmem:[%s1434_s2] ss:$8 sps:$4 sm:$0xff]   ;;  %253 = vmatprep.mubr.bf16.mxu0 %v1133_v2  ;;  %v1074_v3 = vld [vmem:[%s1434_s2 + $0x14] ss:$8 sps:$4 sm:$0xff]  }
   0x2   :  { %221 = vmatprep.subr.bf16.mxu0 %v1071_v0  ;;  %v1076_v4 = vld [vmem:[%s1434_s2 + $0x10] ss:$8 sps:$4 sm:$0xff]   ;;  %v1077_v5 = vld [vmem:[%s1433_s1] sm:$0xff]   ;;  %v1078_v6 = vld [vmem:[%s1433_s1 + $0x8] sm:$0xff]  }
   0x3   :  { %222 = vmatpush1.bf16.msra.mxu0 %v1073_v1  ;;  %v1093_v7 = vld [vmem:[%s1436_s4 + $0x40] sm:$0xff]   ;;  %v1095_v9 = vld [vmem:[%s1436_s4 + $0x48] sm:$0xff]   ;;  %v1079_v10 = vld [vmem:[%s1433_s1 + $0x10] sm:$0xff]  }
   0x4   :  { %223 = vmatprep.subr.bf16.mxu0 %v1074_v3  ;;  %v1094_v8 = vld [vmem:[%s1436_s4] sm:$0xff]   ;;  %1051 = vmatprep.subr.bf16.mxu1 %v1093_v7  ;;  %v1096_v11 = vld [vmem:[%s1436_s4 + $0x8] sm:$0xff]   ;;  %v1097_v12 = vld [vmem:[%s1436_s4 + $0x50] sm:$0xff]  }
   0x5   :  { %1059 = vmatpush3.bf16.msra.mxu1 %v1094_v8  ;;  %v1098_v13 = vld [vmem:[%s1436_s4 + $0x10] sm:$0xff]   ;;  %v1099_v14 = vld [vmem:[%s1436_s4 + $0x58] sm:$0xff]   ;;  %v1101_v17 = vld [vmem:[%s1436_s4 + $0x60] sm:$0xff]  }
   0x6   :  { %1052 = vmatprep.subr.bf16.mxu1 %v1095_v9  ;;  %v1080_v15 = vld [vmem:[%s1433_s1 + $0x18] sm:$0xff]  }
   0x7   :  { %224 = vmatpush1.bf16.msra.mxu0 %v1076_v4  ;;  %v1100_v16 = vld [vmem:[%s1436_s4 + $0x18] sm:$0xff]  }
   0x8   :  { %939 = vmatprep.subr.bf16.mxu0 %v1093_v7 }
   0x9   :  { %1060 = vmatpush3.bf16.msra.mxu1 %v1096_v11 }
   0xa   :  { %906 = vmatmul.mubr.msk.bf16.vlgmr.msra.gmra.mrb[0].mxu0 %vm172_vm0, %v1077_v5  ;;  %1053 = vmatprep.subr.bf16.mxu1 %v1097_v12 }
   0xb   :  { %263 = vmatprep.mubr.bf16.mxu0 %v1133_v2  ;;  %940 = vmatpush3.bf16.msra.mxu0 %v1094_v8 }
   0xc   :  { %941 = vmatprep.subr.bf16.mxu0 %v1095_v9 }
   0xd   :  { %1061 = vmatpush3.bf16.msra.mxu1 %v1098_v13 }
   0xe   :  { %1054 = vmatprep.subr.bf16.mxu1 %v1099_v14 }
   0xf   :  { %942 = vmatpush3.bf16.msra.mxu0 %v1096_v11 }
  0x10   :  { %943 = vmatprep.subr.bf16.mxu0 %v1097_v12 }
  0x12   :  { %907 = vmatmul.mubr.msk.bf16.gmra.mrb[4].mxu0 %vm172_vm0, %v1078_v6 }
  0x13   :  { %273 = vmatprep.mubr.bf16.mxu0 %v1133_v2  ;;  %944 = vmatpush3.bf16.msra.mxu0 %v1098_v13 }
  0x14   :  { %945 = vmatprep.subr.bf16.mxu0 %v1099_v14 }
  0x1a   :  { %908 = vmatmul.mubr.msk.bf16.gmra.mrb[8].mxu0 %vm172_vm0, %v1079_v10 }
  0x1b   :  { %283 = vmatprep.mubr.bf16.mxu0 %v1133_v2 }
  0x1c   :  { %12 = vsyncpa [#allocation5], 0  ;;  %1062 = vmatpush3.bf16.msra.mxu1 %v1100_v16  ;;  %946 = vmatpush3.bf16.msra.mxu0 %v1100_v16  ;;  %v1102_v18 = vld [vmem:[%s1436_s4 + $0x20] sm:$0xff]   ;;  %v1103_v19 = vld [vmem:[%s1436_s4 + $0x68] sm:$0xff]   ;;  %v62_v37 = vlaneseq }
  0x1d   :  { %947 = vmatprep.subr.bf16.mxu0 %v1101_v17  ;;  %1055 = vmatprep.subr.bf16.mxu1 %v1101_v17  ;;  %v1081_v20 = vld [vmem:[%s1433_s1 + $0x20] sm:$0xff]   ;;  %v1082_v21 = vld [vmem:[%s1433_s1 + $0x28] sm:$0xff]   ;;  %v1083_v22 = vld [vmem:[%s1433_s1 + $0x30] sm:$0xff]  }
  0x1e   :  { %v1084_v23 = vld [vmem:[%s1433_s1 + $0x38] sm:$0xff]   ;;  %v1085_v24 = vld [vmem:[%s1433_s1 + $0x40] sm:$0xff]   ;;  %v1086_v25 = vld [vmem:[%s1433_s1 + $0x48] sm:$0xff]   ;;  %v63_v38 = vshrl.u32 %v62_v37, 7 }
  0x1f   :  { %v1087_v26 = vld [vmem:[%s1433_s1 + $0x50] sm:$0xff]   ;;  %v1104_v27 = vld [vmem:[%s1436_s4 + $0x28] sm:$0xff]   ;;  %v1088_v28 = vld [vmem:[%s1433_s1 + $0x58] sm:$0xff]  }
  0x20   :  { %1063 = vmatpush3.bf16.msra.mxu1 %v1102_v18  ;;  %948 = vmatpush3.bf16.msra.mxu0 %v1102_v18  ;;  %v1105_v29 = vld [vmem:[%s1436_s4 + $0x70] sm:$0xff]   ;;  %v1107_v31 = vld [vmem:[%s1436_s4 + $0x78] sm:$0xff]   ;;  %v1089_v33 = vld [vmem:[%s1433_s1 + $0x60] sm:$0xff]   ;;  %v64_v39 = vsub.s32 0, %v63_v38  ;;  %v68_v41 = vsub.s32 1, %v63_v38 }
  0x21   :  { %1056 = vmatprep.subr.bf16.mxu1 %v1103_v19  ;;  %949 = vmatprep.subr.bf16.mxu0 %v1103_v19  ;;  %v1106_v30 = vld [vmem:[%s1436_s4 + $0x30] sm:$0xff]   ;;  %v1108_v32 = vld [vmem:[%s1436_s4 + $0x38] sm:$0xff]   ;;  %v1090_v34 = vld [vmem:[%s1433_s1 + $0x68] sm:$0xff]  }
  0x22   :  { %909 = vmatmul.mubr.msk.bf16.gmra.mrb[12].mxu0 %vm172_vm0, %v1080_v15  ;;  %v1091_v35 = vld [vmem:[%s1433_s1 + $0x70] sm:$0xff]   ;;  %v1092_v36 = vld [vmem:[%s1433_s1 + $0x78] sm:$0xff]   ;;  %v60_v40 = vld [vmem:[%s1435_s3] sm:$0x3] }
  0x23   :  { %293 = vmatprep.mubr.bf16.mxu0 %v1133_v2  ;;  %v1315_v42 = vrot.slane %v60_v40, %v64_v39  ;;  %v1317_v43 = vrot.slane %v60_v40, %v68_v41 }
  0x24   :  { %950 = vmatpush3.bf16.msra.mxu0 %v1104_v27  ;;  %1064 = vmatpush3.bf16.msra.mxu1 %v1104_v27 }
  0x25   :  { %951 = vmatprep.subr.bf16.mxu0 %v1105_v29  ;;  %1057 = vmatprep.subr.bf16.mxu1 %v1105_v29 }
  0x28   :  { %952 = vmatpush3.bf16.msra.mxu0 %v1106_v30  ;;  %1065 = vmatpush3.bf16.msra.mxu1 %v1106_v30 }
  0x29   :  { %953 = vmatprep.subr.bf16.mxu0 %v1107_v31  ;;  %1058 = vmatprep.subr.bf16.mxu1 %v1107_v31 }
  0x2a   :  { %910 = vmatmul.mubr.msk.bf16.gmra.mrb[16].mxu0 %vm172_vm0, %v1081_v20 }
  0x2b   :  { %303 = vmatprep.mubr.bf16.mxu0 %v1133_v2 }
  0x2c   :  { %954 = vmatpush3.bf16.msra.mxu0 %v1108_v32  ;;  %1066 = vmatpush3.bf16.msra.mxu1 %v1108_v32 }
  0x32   :  { %911 = vmatmul.mubr.msk.bf16.gmra.mrb[20].mxu0 %vm172_vm0, %v1082_v21 }
  0x33   :  { %313 = vmatprep.mubr.bf16.mxu0 %v1133_v2 }
  0x3a   :  { %912 = vmatmul.mubr.msk.bf16.gmra.mrb[24].mxu0 %vm172_vm0, %v1083_v22 }
  0x3b   :  { %323 = vmatprep.mubr.bf16.mxu0 %v1133_v2 }
  0x42   :  { %913 = vmatmul.mubr.msk.bf16.gmra.mrb[28].mxu0 %vm172_vm0, %v1084_v23 }
  0x43   :  { %333 = vmatprep.mubr.bf16.mxu0 %v1133_v2 }
  0x4a   :  { %914 = vmatmul.mubr.msk.bf16.gmra.mrb[32].mxu0 %vm172_vm0, %v1085_v24 }
  0x4b   :  { %343 = vmatprep.mubr.bf16.mxu0 %v1133_v2 }
  0x52   :  { %915 = vmatmul.mubr.msk.bf16.gmra.mrb[36].mxu0 %vm172_vm0, %v1086_v25 }
  0x53   :  { %353 = vmatprep.mubr.bf16.mxu0 %v1133_v2 }
  0x5a   :  { %916 = vmatmul.mubr.msk.bf16.gmra.mrb[40].mxu0 %vm172_vm0, %v1087_v26 }
  0x5b   :  { %363 = vmatprep.mubr.bf16.mxu0 %v1133_v2 }
  0x62   :  { %917 = vmatmul.mubr.msk.bf16.gmra.mrb[44].mxu0 %vm172_vm0, %v1088_v28 }
  0x63   :  { %373 = vmatprep.mubr.bf16.mxu0 %v1133_v2 }
  0x6a   :  { %918 = vmatmul.mubr.msk.bf16.gmra.mrb[48].mxu0 %vm172_vm0, %v1089_v33 }
  0x6b   :  { %383 = vmatprep.mubr.bf16.mxu0 %v1133_v2 }
  0x72   :  { %919 = vmatmul.mubr.msk.bf16.gmra.mrb[52].mxu0 %vm172_vm0, %v1090_v34 }
  0x73   :  { %393 = vmatprep.mubr.bf16.mxu0 %v1133_v2 }
  0x7a   :  { %920 = vmatmul.mubr.msk.bf16.gmra.mrb[56].mxu0 %vm172_vm0, %v1091_v35 }
  0x7b   :  { %403 = vmatprep.mubr.bf16.mxu0 %v1133_v2 }
  0x82   :  { %921 = vmatmul.mubr.msk.bf16.gmra.mrb[60].mxu0 %vm172_vm0, %v1092_v36 }
  0xdd   :  { %v255_v44 = vpop.f32.mrb[0].mxu0 }
  0xde   :  { %v256_v45 = vadd.f32 %v255_v44, %v1315_v42  ;;  %v257_v46 = vpop.f32.mrb[1].mxu0 }
  0xdf   :  { %v258_v47 = vadd.f32 %v257_v46, %v1317_v43  ;;  %v259_v48 = vpop.f32.mrb[2].mxu0 }
  0xe0   :  { %v260_v49 = vadd.f32 %v259_v48, %v1315_v42  ;;  %v261_v50 = vpop.f32.mrb[3].mxu0  ;;  %v414_v52 = vmax.f32 %v256_v45, 0.0 }
  0xe1   :  { %v262_v51 = vadd.f32 %v261_v50, %v1317_v43  ;;  %v415_v54 = vmax.f32 %v258_v47, 0.0 }
  0xe2   :  { %v416_v53 = vmax.f32 %v260_v49, 0.0 }
  0xe3   :  { %v417_v55 = vmax.f32 %v262_v51, 0.0 }
  0xe4   :  { %v478_v56 = vpack.c.bf16 %v416_v53, %v414_v52 }
  0xe5   :  { %v479_v57 = vpack.c.bf16 %v417_v55, %v415_v54  ;;  %v265_v58 = vpop.f32.mrb[4].mxu0 }
  0xe6   :  { %v266_v59 = vadd.f32 %v265_v58, %v1315_v42  ;;  %v267_v60 = vpop.f32.mrb[5].mxu0 }
  0xe7   :  { %v268_v61 = vadd.f32 %v267_v60, %v1317_v43  ;;  %v269_v62 = vpop.f32.mrb[6].mxu0  ;;  %677 = vmatprep.mubr.bf16.mxu0 %v479_v57 }
  0xe8   :  { %v270_v63 = vadd.f32 %v269_v62, %v1315_v42  ;;  %v271_v0 = vpop.f32.mrb[7].mxu0  ;;  %678 = vmatmul.mubr.bf16.vlgmr.msra.gmra.mrb[64].mxu0 %v478_v56  ;;  %v418_v2 = vmax.f32 %v266_v59, 0.0 }
  0xe9   :  { %v272_v1 = vadd.f32 %v271_v0, %v1317_v43  ;;  %v419_v4 = vmax.f32 %v268_v61, 0.0 }
  0xea   :  { %v420_v3 = vmax.f32 %v270_v63, 0.0 }
  0xeb   :  { %v421_v5 = vmax.f32 %v272_v1, 0.0 }
  0xec   :  { %v480_v6 = vpack.c.bf16 %v420_v3, %v418_v2 }
  0xed   :  { %v275_v7 = vpop.f32.mrb[8].mxu0  ;;  %v481_v8 = vpack.c.bf16 %v421_v5, %v419_v4 }
  0xee   :  { %v276_v9 = vadd.f32 %v275_v7, %v1315_v42  ;;  %v277_v10 = vpop.f32.mrb[9].mxu0 }
  0xef   :  { %v278_v11 = vadd.f32 %v277_v10, %v1317_v43  ;;  %v279_v12 = vpop.f32.mrb[10].mxu0  ;;  %685 = vmatprep.mubr.bf16.mxu1 %v481_v8 }
  0xf0   :  { %v280_v13 = vadd.f32 %v279_v12, %v1315_v42  ;;  %v281_v14 = vpop.f32.mrb[11].mxu0  ;;  %686 = vmatmul.mubr.bf16.vlgmr.msra.gmra.mrb[0].mxu1 %v480_v6  ;;  %v422_v16 = vmax.f32 %v276_v9, 0.0 }
  0xf1   :  { %v282_v15 = vadd.f32 %v281_v14, %v1317_v43  ;;  %v423_v18 = vmax.f32 %v278_v11, 0.0 }
  0xf2   :  { %v424_v17 = vmax.f32 %v280_v13, 0.0 }
  0xf3   :  { %v425_v19 = vmax.f32 %v282_v15, 0.0 }
  0xf4   :  { %v482_v20 = vpack.c.bf16 %v424_v17, %v422_v16 }
  0xf5   :  { %v483_v21 = vpack.c.bf16 %v425_v19, %v423_v18  ;;  %v285_v22 = vpop.f32.mrb[12].mxu0 }
  0xf6   :  { %v286_v23 = vadd.f32 %v285_v22, %v1315_v42  ;;  %v287_v24 = vpop.f32.mrb[13].mxu0 }
  0xf7   :  { %v288_v25 = vadd.f32 %v287_v24, %v1317_v43  ;;  %v289_v26 = vpop.f32.mrb[14].mxu0  ;;  %693 = vmatprep.mubr.bf16.mxu1 %v483_v21 }
  0xf8   :  { %v290_v27 = vadd.f32 %v289_v26, %v1315_v42  ;;  %v291_v28 = vpop.f32.mrb[15].mxu0  ;;  %694 = vmatmul.mubr.bf16.gmra.mrb[4].mxu1 %v482_v20  ;;  %v426_v30 = vmax.f32 %v286_v23, 0.0 }
  0xf9   :  { %v292_v29 = vadd.f32 %v291_v28, %v1317_v43  ;;  %v427_v32 = vmax.f32 %v288_v25, 0.0 }
  0xfa   :  { %v428_v31 = vmax.f32 %v290_v27, 0.0 }
  0xfb   :  { %v429_v33 = vmax.f32 %v292_v29, 0.0 }
  0xfc   :  { %v484_v34 = vpack.c.bf16 %v428_v31, %v426_v30 }
  0xfd   :  { %v485_v35 = vpack.c.bf16 %v429_v33, %v427_v32  ;;  %v295_v36 = vpop.f32.mrb[16].mxu0 }
  0xfe   :  { %v296_v37 = vadd.f32 %v295_v36, %v1315_v42  ;;  %v297_v38 = vpop.f32.mrb[17].mxu0 }
  0xff   :  { %v298_v39 = vadd.f32 %v297_v38, %v1317_v43  ;;  %v299_v40 = vpop.f32.mrb[18].mxu0  ;;  %701 = vmatprep.mubr.bf16.mxu1 %v485_v35 }
 0x100   :  { %v300_v41 = vadd.f32 %v299_v40, %v1315_v42  ;;  %v301_v44 = vpop.f32.mrb[19].mxu0  ;;  %702 = vmatmul.mubr.bf16.gmra.mrb[8].mxu1 %v484_v34  ;;  %v430_v46 = vmax.f32 %v296_v37, 0.0 }
 0x101   :  { %v302_v45 = vadd.f32 %v301_v44, %v1317_v43  ;;  %v431_v48 = vmax.f32 %v298_v39, 0.0 }
 0x102   :  { %v432_v47 = vmax.f32 %v300_v41, 0.0 }
 0x103   :  { %v433_v49 = vmax.f32 %v302_v45, 0.0 }
 0x104   :  { %v486_v50 = vpack.c.bf16 %v432_v47, %v430_v46 }
 0x105   :  { %v487_v51 = vpack.c.bf16 %v433_v49, %v431_v48  ;;  %v305_v52 = vpop.f32.mrb[20].mxu0 }
 0x106   :  { %v306_v53 = vadd.f32 %v305_v52, %v1315_v42  ;;  %v307_v54 = vpop.f32.mrb[21].mxu0 }
 0x107   :  { %v308_v55 = vadd.f32 %v307_v54, %v1317_v43  ;;  %v309_v56 = vpop.f32.mrb[22].mxu0  ;;  %709 = vmatprep.mubr.bf16.mxu1 %v487_v51 }
 0x108   :  { %v310_v57 = vadd.f32 %v309_v56, %v1315_v42  ;;  %v311_v58 = vpop.f32.mrb[23].mxu0  ;;  %710 = vmatmul.mubr.bf16.gmra.mrb[12].mxu1 %v486_v50  ;;  %v434_v60 = vmax.f32 %v306_v53, 0.0 }
 0x109   :  { %v312_v59 = vadd.f32 %v311_v58, %v1317_v43  ;;  %v435_v62 = vmax.f32 %v308_v55, 0.0 }
 0x10a   :  { %v436_v61 = vmax.f32 %v310_v57, 0.0 }
 0x10b   :  { %v437_v63 = vmax.f32 %v312_v59, 0.0 }
 0x10c   :  { %v488_v0 = vpack.c.bf16 %v436_v61, %v434_v60 }
 0x10d   :  { %v489_v1 = vpack.c.bf16 %v437_v63, %v435_v62  ;;  %v315_v2 = vpop.f32.mrb[24].mxu0 }
 0x10e   :  { %v316_v3 = vadd.f32 %v315_v2, %v1315_v42  ;;  %v317_v4 = vpop.f32.mrb[25].mxu0 }
 0x10f   :  { %v318_v5 = vadd.f32 %v317_v4, %v1317_v43  ;;  %v319_v6 = vpop.f32.mrb[26].mxu0  ;;  %717 = vmatprep.mubr.bf16.mxu1 %v489_v1 }
 0x110   :  { %v320_v7 = vadd.f32 %v319_v6, %v1315_v42  ;;  %v321_v8 = vpop.f32.mrb[27].mxu0  ;;  %718 = vmatmul.mubr.bf16.gmra.mrb[16].mxu1 %v488_v0  ;;  %v438_v10 = vmax.f32 %v316_v3, 0.0 }
 0x111   :  { %v322_v9 = vadd.f32 %v321_v8, %v1317_v43  ;;  %v439_v12 = vmax.f32 %v318_v5, 0.0 }
 0x112   :  { %v440_v11 = vmax.f32 %v320_v7, 0.0 }
 0x113   :  { %v441_v13 = vmax.f32 %v322_v9, 0.0 }
 0x114   :  { %v490_v14 = vpack.c.bf16 %v440_v11, %v438_v10 }
 0x115   :  { %v491_v15 = vpack.c.bf16 %v441_v13, %v439_v12  ;;  %v325_v16 = vpop.f32.mrb[28].mxu0 }
 0x116   :  { %v326_v17 = vadd.f32 %v325_v16, %v1315_v42  ;;  %v327_v18 = vpop.f32.mrb[29].mxu0 }
 0x117   :  { %v328_v19 = vadd.f32 %v327_v18, %v1317_v43  ;;  %v329_v20 = vpop.f32.mrb[30].mxu0  ;;  %725 = vmatprep.mubr.bf16.mxu1 %v491_v15 }
 0x118   :  { %v330_v21 = vadd.f32 %v329_v20, %v1315_v42  ;;  %v331_v22 = vpop.f32.mrb[31].mxu0  ;;  %726 = vmatmul.mubr.bf16.gmra.mrb[20].mxu1 %v490_v14  ;;  %v442_v24 = vmax.f32 %v326_v17, 0.0 }
 0x119   :  { %v332_v23 = vadd.f32 %v331_v22, %v1317_v43  ;;  %v443_v26 = vmax.f32 %v328_v19, 0.0 }
 0x11a   :  { %v444_v25 = vmax.f32 %v330_v21, 0.0 }
 0x11b   :  { %v445_v27 = vmax.f32 %v332_v23, 0.0 }
 0x11c   :  { %v492_v28 = vpack.c.bf16 %v444_v25, %v442_v24 }
 0x11d   :  { %v493_v29 = vpack.c.bf16 %v445_v27, %v443_v26  ;;  %v335_v30 = vpop.f32.mrb[32].mxu0 }
 0x11e   :  { %v336_v31 = vadd.f32 %v335_v30, %v1315_v42  ;;  %v337_v32 = vpop.f32.mrb[33].mxu0 }
 0x11f   :  { %v338_v33 = vadd.f32 %v337_v32, %v1317_v43  ;;  %v339_v34 = vpop.f32.mrb[34].mxu0  ;;  %733 = vmatprep.mubr.bf16.mxu1 %v493_v29 }
 0x120   :  { %v340_v35 = vadd.f32 %v339_v34, %v1315_v42  ;;  %v341_v36 = vpop.f32.mrb[35].mxu0  ;;  %734 = vmatmul.mubr.bf16.gmra.mrb[24].mxu1 %v492_v28  ;;  %v446_v38 = vmax.f32 %v336_v31, 0.0 }
 0x121   :  { %v342_v37 = vadd.f32 %v341_v36, %v1317_v43  ;;  %v447_v40 = vmax.f32 %v338_v33, 0.0 }
 0x122   :  { %v448_v39 = vmax.f32 %v340_v35, 0.0 }
 0x123   :  { %v449_v41 = vmax.f32 %v342_v37, 0.0 }
 0x124   :  { %v494_v44 = vpack.c.bf16 %v448_v39, %v446_v38 }
 0x125   :  { %v495_v45 = vpack.c.bf16 %v449_v41, %v447_v40  ;;  %v345_v46 = vpop.f32.mrb[36].mxu0 }
 0x126   :  { %v346_v47 = vadd.f32 %v345_v46, %v1315_v42  ;;  %v347_v48 = vpop.f32.mrb[37].mxu0 }
 0x127   :  { %v348_v49 = vadd.f32 %v347_v48, %v1317_v43  ;;  %v349_v50 = vpop.f32.mrb[38].mxu0  ;;  %741 = vmatprep.mubr.bf16.mxu1 %v495_v45 }
 0x128   :  { %v350_v51 = vadd.f32 %v349_v50, %v1315_v42  ;;  %v351_v52 = vpop.f32.mrb[39].mxu0  ;;  %742 = vmatmul.mubr.bf16.gmra.mrb[28].mxu1 %v494_v44  ;;  %v450_v54 = vmax.f32 %v346_v47, 0.0 }
 0x129   :  { %v352_v53 = vadd.f32 %v351_v52, %v1317_v43  ;;  %v451_v56 = vmax.f32 %v348_v49, 0.0 }
 0x12a   :  { %v452_v55 = vmax.f32 %v350_v51, 0.0 }
 0x12b   :  { %v453_v57 = vmax.f32 %v352_v53, 0.0 }
 0x12c   :  { %v496_v58 = vpack.c.bf16 %v452_v55, %v450_v54 }
 0x12d   :  { %v497_v59 = vpack.c.bf16 %v453_v57, %v451_v56  ;;  %v355_v60 = vpop.f32.mrb[40].mxu0 }
 0x12e   :  { %v356_v61 = vadd.f32 %v355_v60, %v1315_v42  ;;  %v357_v62 = vpop.f32.mrb[41].mxu0 }
 0x12f   :  { %v358_v63 = vadd.f32 %v357_v62, %v1317_v43  ;;  %v359_v0 = vpop.f32.mrb[42].mxu0  ;;  %749 = vmatprep.mubr.bf16.mxu1 %v497_v59 }
 0x130   :  { %v360_v1 = vadd.f32 %v359_v0, %v1315_v42  ;;  %v361_v2 = vpop.f32.mrb[43].mxu0  ;;  %750 = vmatmul.mubr.bf16.gmra.mrb[32].mxu1 %v496_v58  ;;  %v454_v4 = vmax.f32 %v356_v61, 0.0 }
 0x131   :  { %v362_v3 = vadd.f32 %v361_v2, %v1317_v43  ;;  %v455_v6 = vmax.f32 %v358_v63, 0.0 }
 0x132   :  { %v456_v5 = vmax.f32 %v360_v1, 0.0 }
 0x133   :  { %v457_v7 = vmax.f32 %v362_v3, 0.0 }
 0x134   :  { %v498_v8 = vpack.c.bf16 %v456_v5, %v454_v4 }
 0x135   :  { %v499_v9 = vpack.c.bf16 %v457_v7, %v455_v6  ;;  %v365_v10 = vpop.f32.mrb[44].mxu0 }
 0x136   :  { %v366_v11 = vadd.f32 %v365_v10, %v1315_v42  ;;  %v367_v12 = vpop.f32.mrb[45].mxu0 }
 0x137   :  { %v368_v13 = vadd.f32 %v367_v12, %v1317_v43  ;;  %v369_v14 = vpop.f32.mrb[46].mxu0  ;;  %757 = vmatprep.mubr.bf16.mxu1 %v499_v9 }
 0x138   :  { %v370_v15 = vadd.f32 %v369_v14, %v1315_v42  ;;  %v371_v16 = vpop.f32.mrb[47].mxu0  ;;  %758 = vmatmul.mubr.bf16.gmra.mrb[36].mxu1 %v498_v8  ;;  %v458_v18 = vmax.f32 %v366_v11, 0.0 }
 0x139   :  { %v372_v17 = vadd.f32 %v371_v16, %v1317_v43  ;;  %v459_v20 = vmax.f32 %v368_v13, 0.0 }
 0x13a   :  { %v460_v19 = vmax.f32 %v370_v15, 0.0 }
 0x13b   :  { %v461_v21 = vmax.f32 %v372_v17, 0.0 }
 0x13c   :  { %v500_v22 = vpack.c.bf16 %v460_v19, %v458_v18  ;;  %v1386_v19 = vld [vmem:[%s1437_s5] ss:$0 sm:$0xff]  ;;  %s1134_s5 = smov [#allocation4]  }
 0x13d   :  { %v501_v23 = vpack.c.bf16 %v461_v21, %v459_v20  ;;  %v375_v24 = vpop.f32.mrb[48].mxu0  ;;  %s875_s16 = sshll.u32 %s1134_s5, 4  ;;  %s876_s16 = int_to_ptr.vmem [resolvable:$true] %s875_s16 }
 0x13e   :  { %v376_v25 = vadd.f32 %v375_v24, %v1315_v42  ;;  %v377_v26 = vpop.f32.mrb[49].mxu0  ;;  %s1109_s17 = scalar_lea.vmem %s876_s16, 4096  ;;  %p1114_p1 = scmp.lt.s32.totalorder %s876_s16, %s876_s16 }
 0x13f   :  { %v378_v27 = vadd.f32 %v377_v26, %v1317_v43  ;;  %v379_v28 = vpop.f32.mrb[50].mxu0  ;;  %765 = vmatprep.mubr.bf16.mxu1 %v501_v23  ;;  %p1110_p0 = scmp.ne.s32.totalorder %s876_s16, %s1109_s17  ;;  %p1115_p2 = scmp.lt.s32.totalorder %s1109_s17, %s1109_s17 }
 0x140   :  { %v380_v29 = vadd.f32 %v379_v28, %v1315_v42  ;;  %v381_v30 = vpop.f32.mrb[51].mxu0  ;;  %766 = vmatmul.mubr.bf16.gmra.mrb[40].mxu1 %v500_v22  ;;  %v462_v32 = vmax.f32 %v376_v25, 0.0 }
 0x141   :  { %v382_v31 = vadd.f32 %v381_v30, %v1317_v43  ;;  %v463_v34 = vmax.f32 %v378_v27, 0.0  ;;  %p1116_p3 = por %p1115_p2, %p1114_p1 }
 0x142   :  { %v464_v33 = vmax.f32 %v380_v29, 0.0 }
 0x143   :  { %v465_v35 = vmax.f32 %v382_v31, 0.0  ;;  %p1117_p4 = pnand %p1116_p3, %p1110_p0 }
 0x144   :  { %v502_v36 = vpack.c.bf16 %v464_v33, %v462_v32 }
 0x145   :  { %v503_v37 = vpack.c.bf16 %v465_v35, %v463_v34  ;;  %v385_v38 = vpop.f32.mrb[52].mxu0 }
 0x146   :  { %v386_v39 = vadd.f32 %v385_v38, %v1315_v42  ;;  %v387_v40 = vpop.f32.mrb[53].mxu0 }
 0x147   :  { %v388_v41 = vadd.f32 %v387_v40, %v1317_v43  ;;  %v389_v44 = vpop.f32.mrb[54].mxu0  ;;  %773 = vmatprep.mubr.bf16.mxu1 %v503_v37 }
 0x148   :  { %v390_v45 = vadd.f32 %v389_v44, %v1315_v42  ;;  %v391_v46 = vpop.f32.mrb[55].mxu0  ;;  %774 = vmatmul.mubr.bf16.gmra.mrb[44].mxu1 %v502_v36  ;;  %v466_v48 = vmax.f32 %v386_v39, 0.0 }
 0x149   :  { %v392_v47 = vadd.f32 %v391_v46, %v1317_v43  ;;  %v467_v50 = vmax.f32 %v388_v41, 0.0 }
 0x14a   :  { %v468_v49 = vmax.f32 %v390_v45, 0.0 }
 0x14b   :  { %v469_v51 = vmax.f32 %v392_v47, 0.0 }
 0x14c   :  { %v504_v52 = vpack.c.bf16 %v468_v49, %v466_v48 }
 0x14d   :  { %v505_v53 = vpack.c.bf16 %v469_v51, %v467_v50  ;;  %v395_v54 = vpop.f32.mrb[56].mxu0 }
 0x14e   :  { %v396_v55 = vadd.f32 %v395_v54, %v1315_v42  ;;  %v397_v56 = vpop.f32.mrb[57].mxu0 }
 0x14f   :  { %v398_v57 = vadd.f32 %v397_v56, %v1317_v43  ;;  %v399_v58 = vpop.f32.mrb[58].mxu0  ;;  %781 = vmatprep.mubr.bf16.mxu1 %v505_v53 }
 0x150   :  { %v400_v59 = vadd.f32 %v399_v58, %v1315_v42  ;;  %v401_v60 = vpop.f32.mrb[59].mxu0  ;;  %782 = vmatmul.mubr.bf16.gmra.mrb[48].mxu1 %v504_v52  ;;  %v470_v62 = vmax.f32 %v396_v55, 0.0 }
 0x151   :  { %v402_v61 = vadd.f32 %v401_v60, %v1317_v43  ;;  %v471_v0 = vmax.f32 %v398_v57, 0.0 }
 0x152   :  { %v472_v63 = vmax.f32 %v400_v59, 0.0 }
 0x153   :  { %v473_v1 = vmax.f32 %v402_v61, 0.0 }
 0x154   :  { %v506_v2 = vpack.c.bf16 %v472_v63, %v470_v62 }
 0x155   :  { %v507_v3 = vpack.c.bf16 %v473_v1, %v471_v0  ;;  %v405_v4 = vpop.f32.mrb[60].mxu0 }
 0x156   :  { %v406_v5 = vadd.f32 %v405_v4, %v1315_v42  ;;  %v407_v6 = vpop.f32.mrb[61].mxu0 }
 0x157   :  { %v408_v7 = vadd.f32 %v407_v6, %v1317_v43  ;;  %v409_v8 = vpop.f32.mrb[62].mxu0  ;;  %789 = vmatprep.mubr.bf16.mxu1 %v507_v3 }
 0x158   :  { %v410_v9 = vadd.f32 %v409_v8, %v1315_v42  ;;  %v411_v10 = vpop.f32.mrb[63].mxu0  ;;  %790 = vmatmul.mubr.bf16.gmra.mrb[52].mxu1 %v506_v2  ;;  %v474_v12 = vmax.f32 %v406_v5, 0.0 }
 0x159   :  { %v412_v11 = vadd.f32 %v411_v10, %v1317_v43  ;;  %v475_v14 = vmax.f32 %v408_v7, 0.0 }
 0x15a   :  { %v476_v13 = vmax.f32 %v410_v9, 0.0 }
 0x15b   :  { %v477_v15 = vmax.f32 %v412_v11, 0.0 }
 0x15c   :  { %v508_v16 = vpack.c.bf16 %v476_v13, %v474_v12 }
 0x15d   :  { %v509_v17 = vpack.c.bf16 %v477_v15, %v475_v14 }
 0x15f   :  { %797 = vmatprep.mubr.bf16.mxu1 %v509_v17 }
 0x160   :  { %798 = vmatmul.mubr.bf16.gmra.mrb[56].mxu1 %v508_v16 }
 0x1bb   :  { %v955_v18 = vpop.f32.mrb[64].mxu0 }
 0x1bc   :  { %v956_v20 = vpop.f32.mrb[65].mxu0 }
 0x1bd   :  { %v957_v42 = vadd.f32 %v956_v20, %v955_v18  ;;  %v958_v21 = vpop.f32.mrb[66].mxu0 }
 0x1be   :  { %v959_v22 = vpop.f32.mrb[67].mxu0 }
 0x1bf   :  { %v680_v43 = vadd.f32 %v957_v42, %v1386_v19  ;;  %v960_v23 = vadd.f32 %v959_v22, %v958_v21 }
 0x1c1   :  { %v806_v24 = vmax.f32 %v680_v43, 0.0  ;;  %v683_v25 = vadd.f32 %v960_v23, %v1386_v19 }
 0x1c3   :  { %838 = vst [vmem:[#allocation4] sm:$0xff] %v806_v24  ;;  %v807_v26 = vmax.f32 %v683_v25, 0.0  ;;  %v961_v27 = vpop.f32.mrb[0].mxu1 }
 0x1c4   :  { %v962_v28 = vpop.f32.mrb[1].mxu1 }
 0x1c5   :  { %839 = vst [vmem:[#allocation4 + $0x8] sm:$0xff] %v807_v26  ;;  %v963_v29 = vadd.f32 %v962_v28, %v961_v27  ;;  %v964_v30 = vpop.f32.mrb[2].mxu1 }
 0x1c6   :  { %v965_v31 = vpop.f32.mrb[3].mxu1 }
 0x1c7   :  { %v688_v32 = vadd.f32 %v963_v29, %v1386_v19  ;;  %v966_v33 = vadd.f32 %v965_v31, %v964_v30 }
 0x1c9   :  { %v808_v34 = vmax.f32 %v688_v32, 0.0  ;;  %v691_v35 = vadd.f32 %v966_v33, %v1386_v19 }
 0x1cb   :  { %840 = vst [vmem:[#allocation4 + $0x10] sm:$0xff] %v808_v34  ;;  %v809_v36 = vmax.f32 %v691_v35, 0.0  ;;  %v967_v37 = vpop.f32.mrb[4].mxu1 }
 0x1cc   :  { %v968_v38 = vpop.f32.mrb[5].mxu1 }
 0x1cd   :  { %841 = vst [vmem:[#allocation4 + $0x18] sm:$0xff] %v809_v36  ;;  %v969_v39 = vadd.f32 %v968_v38, %v967_v37  ;;  %v970_v40 = vpop.f32.mrb[6].mxu1 }
 0x1ce   :  { %v971_v41 = vpop.f32.mrb[7].mxu1 }
 0x1cf   :  { %v696_v44 = vadd.f32 %v969_v39, %v1386_v19  ;;  %v972_v45 = vadd.f32 %v971_v41, %v970_v40 }
 0x1d1   :  { %v810_v46 = vmax.f32 %v696_v44, 0.0  ;;  %v699_v47 = vadd.f32 %v972_v45, %v1386_v19 }
 0x1d3   :  { %842 = vst [vmem:[#allocation4 + $0x20] sm:$0xff] %v810_v46  ;;  %v811_v48 = vmax.f32 %v699_v47, 0.0  ;;  %v973_v49 = vpop.f32.mrb[8].mxu1 }
 0x1d4   :  { %v974_v50 = vpop.f32.mrb[9].mxu1 }
 0x1d5   :  { %843 = vst [vmem:[#allocation4 + $0x28] sm:$0xff] %v811_v48  ;;  %v975_v51 = vadd.f32 %v974_v50, %v973_v49  ;;  %v976_v52 = vpop.f32.mrb[10].mxu1 }
 0x1d6   :  { %v977_v53 = vpop.f32.mrb[11].mxu1 }
 0x1d7   :  { %v704_v54 = vadd.f32 %v975_v51, %v1386_v19  ;;  %v978_v55 = vadd.f32 %v977_v53, %v976_v52 }
 0x1d9   :  { %v812_v56 = vmax.f32 %v704_v54, 0.0  ;;  %v707_v57 = vadd.f32 %v978_v55, %v1386_v19 }
 0x1db   :  { %844 = vst [vmem:[#allocation4 + $0x30] sm:$0xff] %v812_v56  ;;  %v813_v58 = vmax.f32 %v707_v57, 0.0  ;;  %v979_v59 = vpop.f32.mrb[12].mxu1 }
 0x1dc   :  { %v980_v60 = vpop.f32.mrb[13].mxu1 }
 0x1dd   :  { %845 = vst [vmem:[#allocation4 + $0x38] sm:$0xff] %v813_v58  ;;  %v981_v61 = vadd.f32 %v980_v60, %v979_v59  ;;  %v982_v62 = vpop.f32.mrb[14].mxu1 }
 0x1de   :  { %v983_v63 = vpop.f32.mrb[15].mxu1 }
 0x1df   :  { %v712_v0 = vadd.f32 %v981_v61, %v1386_v19  ;;  %v984_v1 = vadd.f32 %v983_v63, %v982_v62 }
 0x1e1   :  { %v814_v2 = vmax.f32 %v712_v0, 0.0  ;;  %v715_v3 = vadd.f32 %v984_v1, %v1386_v19 }
 0x1e3   :  { %846 = vst [vmem:[#allocation4 + $0x40] sm:$0xff] %v814_v2  ;;  %v815_v4 = vmax.f32 %v715_v3, 0.0  ;;  %v985_v5 = vpop.f32.mrb[16].mxu1 }
 0x1e4   :  { %v986_v6 = vpop.f32.mrb[17].mxu1 }
 0x1e5   :  { %847 = vst [vmem:[#allocation4 + $0x48] sm:$0xff] %v815_v4  ;;  %v987_v7 = vadd.f32 %v986_v6, %v985_v5  ;;  %v988_v8 = vpop.f32.mrb[18].mxu1 }
 0x1e6   :  { %v989_v9 = vpop.f32.mrb[19].mxu1 }
 0x1e7   :  { %v720_v10 = vadd.f32 %v987_v7, %v1386_v19  ;;  %v990_v11 = vadd.f32 %v989_v9, %v988_v8 }
 0x1e9   :  { %v816_v12 = vmax.f32 %v720_v10, 0.0  ;;  %v723_v13 = vadd.f32 %v990_v11, %v1386_v19 }
 0x1eb   :  { %848 = vst [vmem:[#allocation4 + $0x50] sm:$0xff] %v816_v12  ;;  %v817_v14 = vmax.f32 %v723_v13, 0.0  ;;  %v991_v15 = vpop.f32.mrb[20].mxu1 }
 0x1ec   :  { %v992_v16 = vpop.f32.mrb[21].mxu1 }
 0x1ed   :  { %849 = vst [vmem:[#allocation4 + $0x58] sm:$0xff] %v817_v14  ;;  %v993_v17 = vadd.f32 %v992_v16, %v991_v15  ;;  %v994_v18 = vpop.f32.mrb[22].mxu1 }
 0x1ee   :  { %v995_v20 = vpop.f32.mrb[23].mxu1 }
 0x1ef   :  { %v728_v42 = vadd.f32 %v993_v17, %v1386_v19  ;;  %v996_v21 = vadd.f32 %v995_v20, %v994_v18 }
 0x1f1   :  { %v818_v22 = vmax.f32 %v728_v42, 0.0  ;;  %v731_v43 = vadd.f32 %v996_v21, %v1386_v19 }
 0x1f3   :  { %850 = vst [vmem:[#allocation4 + $0x60] sm:$0xff] %v818_v22  ;;  %v819_v23 = vmax.f32 %v731_v43, 0.0  ;;  %v997_v24 = vpop.f32.mrb[24].mxu1 }
 0x1f4   :  { %v998_v25 = vpop.f32.mrb[25].mxu1 }
 0x1f5   :  { %851 = vst [vmem:[#allocation4 + $0x68] sm:$0xff] %v819_v23  ;;  %v999_v26 = vadd.f32 %v998_v25, %v997_v24  ;;  %v1000_v27 = vpop.f32.mrb[26].mxu1 }
 0x1f6   :  { %v1001_v28 = vpop.f32.mrb[27].mxu1 }
 0x1f7   :  { %v736_v29 = vadd.f32 %v999_v26, %v1386_v19  ;;  %v1002_v30 = vadd.f32 %v1001_v28, %v1000_v27 }
 0x1f9   :  { %v820_v31 = vmax.f32 %v736_v29, 0.0  ;;  %v739_v32 = vadd.f32 %v1002_v30, %v1386_v19 }
 0x1fb   :  { %852 = vst [vmem:[#allocation4 + $0x70] sm:$0xff] %v820_v31  ;;  %v821_v33 = vmax.f32 %v739_v32, 0.0  ;;  %v1003_v34 = vpop.f32.mrb[28].mxu1 }
 0x1fc   :  { %v1004_v35 = vpop.f32.mrb[29].mxu1 }
 0x1fd   :  { %853 = vst [vmem:[#allocation4 + $0x78] sm:$0xff] %v821_v33  ;;  %v1005_v36 = vadd.f32 %v1004_v35, %v1003_v34  ;;  %v1006_v37 = vpop.f32.mrb[30].mxu1 }
 0x1fe   :  { %v1007_v38 = vpop.f32.mrb[31].mxu1 }
 0x1ff   :  { %v744_v39 = vadd.f32 %v1005_v36, %v1386_v19  ;;  %v1008_v40 = vadd.f32 %v1007_v38, %v1006_v37 }
 0x201   :  { %v822_v41 = vmax.f32 %v744_v39, 0.0  ;;  %v747_v44 = vadd.f32 %v1008_v40, %v1386_v19 }
 0x203   :  { %854 = vst [vmem:[#allocation4 + $0x80] sm:$0xff] %v822_v41  ;;  %v823_v45 = vmax.f32 %v747_v44, 0.0  ;;  %v1009_v46 = vpop.f32.mrb[32].mxu1 }
 0x204   :  { %v1010_v47 = vpop.f32.mrb[33].mxu1 }
 0x205   :  { %855 = vst [vmem:[#allocation4 + $0x88] sm:$0xff] %v823_v45  ;;  %v1011_v48 = vadd.f32 %v1010_v47, %v1009_v46  ;;  %v1012_v49 = vpop.f32.mrb[34].mxu1 }
 0x206   :  { %v1013_v50 = vpop.f32.mrb[35].mxu1 }
 0x207   :  { %v752_v51 = vadd.f32 %v1011_v48, %v1386_v19  ;;  %v1014_v52 = vadd.f32 %v1013_v50, %v1012_v49 }
 0x209   :  { %v824_v53 = vmax.f32 %v752_v51, 0.0  ;;  %v755_v54 = vadd.f32 %v1014_v52, %v1386_v19 }
 0x20b   :  { %856 = vst [vmem:[#allocation4 + $0x90] sm:$0xff] %v824_v53  ;;  %v825_v55 = vmax.f32 %v755_v54, 0.0  ;;  %v1015_v56 = vpop.f32.mrb[36].mxu1 }
 0x20c   :  { %v1016_v57 = vpop.f32.mrb[37].mxu1 }
 0x20d   :  { %857 = vst [vmem:[#allocation4 + $0x98] sm:$0xff] %v825_v55  ;;  %v1017_v58 = vadd.f32 %v1016_v57, %v1015_v56  ;;  %v1018_v59 = vpop.f32.mrb[38].mxu1 }
 0x20e   :  { %v1019_v60 = vpop.f32.mrb[39].mxu1 }
 0x20f   :  { %v760_v61 = vadd.f32 %v1017_v58, %v1386_v19  ;;  %v1020_v62 = vadd.f32 %v1019_v60, %v1018_v59 }
 0x211   :  { %v826_v63 = vmax.f32 %v760_v61, 0.0  ;;  %v763_v0 = vadd.f32 %v1020_v62, %v1386_v19 }
 0x213   :  { %858 = vst [vmem:[#allocation4 + $0xa0] sm:$0xff] %v826_v63  ;;  %v827_v1 = vmax.f32 %v763_v0, 0.0  ;;  %v1021_v2 = vpop.f32.mrb[40].mxu1 }
 0x214   :  { %v1022_v3 = vpop.f32.mrb[41].mxu1 }
 0x215   :  { %859 = vst [vmem:[#allocation4 + $0xa8] sm:$0xff] %v827_v1  ;;  %v1023_v4 = vadd.f32 %v1022_v3, %v1021_v2  ;;  %v1024_v5 = vpop.f32.mrb[42].mxu1 }
 0x216   :  { %v1025_v6 = vpop.f32.mrb[43].mxu1 }
 0x217   :  { %v768_v7 = vadd.f32 %v1023_v4, %v1386_v19  ;;  %v1026_v8 = vadd.f32 %v1025_v6, %v1024_v5 }
 0x219   :  { %v828_v9 = vmax.f32 %v768_v7, 0.0  ;;  %v771_v10 = vadd.f32 %v1026_v8, %v1386_v19 }
 0x21b   :  { %860 = vst [vmem:[#allocation4 + $0xb0] sm:$0xff] %v828_v9  ;;  %v829_v11 = vmax.f32 %v771_v10, 0.0  ;;  %v1027_v12 = vpop.f32.mrb[44].mxu1 }
 0x21c   :  { %v1028_v13 = vpop.f32.mrb[45].mxu1 }
 0x21d   :  { %861 = vst [vmem:[#allocation4 + $0xb8] sm:$0xff] %v829_v11  ;;  %v1029_v14 = vadd.f32 %v1028_v13, %v1027_v12  ;;  %v1030_v15 = vpop.f32.mrb[46].mxu1 }
 0x21e   :  { %v1031_v16 = vpop.f32.mrb[47].mxu1 }
 0x21f   :  { %v776_v17 = vadd.f32 %v1029_v14, %v1386_v19  ;;  %v1032_v18 = vadd.f32 %v1031_v16, %v1030_v15 }
 0x221   :  { %v830_v20 = vmax.f32 %v776_v17, 0.0  ;;  %v779_v42 = vadd.f32 %v1032_v18, %v1386_v19 }
 0x223   :  { %862 = vst [vmem:[#allocation4 + $0xc0] sm:$0xff] %v830_v20  ;;  %v831_v21 = vmax.f32 %v779_v42, 0.0  ;;  %v1033_v22 = vpop.f32.mrb[48].mxu1 }
 0x224   :  { %v1034_v43 = vpop.f32.mrb[49].mxu1 }
 0x225   :  { %863 = vst [vmem:[#allocation4 + $0xc8] sm:$0xff] %v831_v21  ;;  %v1035_v23 = vadd.f32 %v1034_v43, %v1033_v22  ;;  %v1036_v24 = vpop.f32.mrb[50].mxu1 }
 0x226   :  { %v1037_v25 = vpop.f32.mrb[51].mxu1 }
 0x227   :  { %v784_v26 = vadd.f32 %v1035_v23, %v1386_v19  ;;  %v1038_v27 = vadd.f32 %v1037_v25, %v1036_v24 }
 0x229   :  { %v832_v28 = vmax.f32 %v784_v26, 0.0  ;;  %v787_v29 = vadd.f32 %v1038_v27, %v1386_v19 }
 0x22b   :  { %864 = vst [vmem:[#allocation4 + $0xd0] sm:$0xff] %v832_v28  ;;  %v833_v30 = vmax.f32 %v787_v29, 0.0  ;;  %v1039_v31 = vpop.f32.mrb[52].mxu1 }
 0x22c   :  { %v1040_v32 = vpop.f32.mrb[53].mxu1 }
 0x22d   :  { %865 = vst [vmem:[#allocation4 + $0xd8] sm:$0xff] %v833_v30  ;;  %v1041_v33 = vadd.f32 %v1040_v32, %v1039_v31  ;;  %v1042_v34 = vpop.f32.mrb[54].mxu1 }
 0x22e   :  { %v1043_v35 = vpop.f32.mrb[55].mxu1 }
 0x22f   :  { %v792_v36 = vadd.f32 %v1041_v33, %v1386_v19  ;;  %v1044_v37 = vadd.f32 %v1043_v35, %v1042_v34 }
 0x231   :  { %v834_v38 = vmax.f32 %v792_v36, 0.0  ;;  %v795_v39 = vadd.f32 %v1044_v37, %v1386_v19 }
 0x233   :  { %866 = vst [vmem:[#allocation4 + $0xe0] sm:$0xff] %v834_v38  ;;  %v835_v40 = vmax.f32 %v795_v39, 0.0  ;;  %v1045_v41 = vpop.f32.mrb[56].mxu1 }
 0x234   :  { %v1046_v44 = vpop.f32.mrb[57].mxu1 }
 0x235   :  { %867 = vst [vmem:[#allocation4 + $0xe8] sm:$0xff] %v835_v40  ;;  %v1047_v45 = vadd.f32 %v1046_v44, %v1045_v41  ;;  %v1048_v46 = vpop.f32.mrb[58].mxu1 }
 0x236   :  { %v1049_v47 = vpop.f32.mrb[59].mxu1 }
 0x237   :  { %v800_v48 = vadd.f32 %v1047_v45, %v1386_v19  ;;  %v1050_v49 = vadd.f32 %v1049_v47, %v1048_v46 }
 0x239   :  { %v836_v50 = vmax.f32 %v800_v48, 0.0  ;;  %v803_v51 = vadd.f32 %v1050_v49, %v1386_v19 }
 0x23b   :  { %868 = vst [vmem:[#allocation4 + $0xf0] sm:$0xff] %v836_v50  ;;  %v837_v52 = vmax.f32 %v803_v51, 0.0 }
 0x23d   :  { %869 = vst [vmem:[#allocation4 + $0xf8] sm:$0xff] %v837_v52 }
 0x23e   :  { %1120 = shalt.err (!%p1117_p4)
}
 0x23f   :  { %s1121_s20 = scalar_lea.hbm %s1438_s6, 4096 }
 0x240   :  { %p1122_p5 = scmp.ne.s32.totalorder %s1438_s6, %s1121_s20  ;;  %p1125_p6 = scmp.lt.u32.totalorder %s1121_s20, %s1438_s6 }
 0x242   :  { %p1127_p7 = pnand %p1125_p6, %p1122_p5 }
 0x244   :  { %1130 = shalt.err (!%p1127_p7)
}
 0x245   :  { %s1135_s24 = smov 128   ;;  %s1136_s25 = smov 8  }
 0x246   :  { %881 = dma.vmem_to_hbm [thread:$0]  %s876_s16, 4096, %s1438_s6, [#allocation5], %s1135_s24, %s1135_s24, %s1136_s25  }
 0x247   :  { %1131 = dma.done.wait [#allocation5], 4096  }
 0x248   :  { %1132 = vsyncadd [#allocation5], 4294963200 }
 0x249   :  { %885 = vsyncpa [#allocation5], 1 }

</bundles_post_ra>
